<compile_context>
chip_gen: v7x
topology: tpu7x:2x2x1
jax: 0.10.0
libtpu: 0.0.40
codegen_flags: <defaults>
</compile_context>

<pallas_src>
import jax
import jax.numpy as jnp
from jax.experimental import pallas as pl
from jax.experimental.pallas import tpu as pltpu


def _round_up(n: int, m: int) -> int:
    return ((n + m - 1) // m) * m


def generator_kernel(x_ref, w1_ref, b1_ref, w2_ref, b2_ref, o_ref):
    # Linear(z_dim, 256): bf16 operands, f32 accumulation on the MXU.
    h = jnp.dot(x_ref[...], w1_ref[...], preferred_element_type=jnp.float32)
    h = h + b1_ref[...]                       # (TM, 256) + (1, 256), f32
    # LeakyReLU(0.1) in f32.
    h = jnp.where(h > 0, h, 0.1 * h)
    # Linear(256, img_dim): cast activations back to bf16 for the MXU.
    y = jnp.dot(h.astype(w2_ref.dtype), w2_ref[...],
                preferred_element_type=jnp.float32)
    y = y + b2_ref[...]                       # (TM, img_dim) + (1, img_dim), f32
    # Tanh in f32, store in bf16 (halves the store-bound HBM traffic).
    o_ref[...] = jnp.tanh(y).astype(o_ref.dtype)


def generator_forward(x, w1, b1, w2, b2, *, block_m: int = 512):
    batch, z_dim = x.shape
    hidden = w1.shape[1]
    img_dim = w2.shape[1]

    # Biases: accept 1-D (PyTorch convention) or (1, N); biases stay f32
    # (added post-accumulation).
    b1 = jnp.asarray(b1, jnp.float32).reshape(1, hidden)
    b2 = jnp.asarray(b2, jnp.float32).reshape(1, img_dim)

    # --- K alignment: zero-pad z_dim up to a multiple of 128 (exact result) ---
    k_pad = _round_up(z_dim, 128)
    if k_pad != z_dim:
        x = jnp.pad(x, ((0, 0), (0, k_pad - z_dim)))
        w1 = jnp.pad(w1, ((0, k_pad - z_dim), (0, 0)))

    # --- batch tiling: TM=512 for real batches, rounded-up batch for tiny ones ---
    tm = min(block_m, _round_up(batch, 8))
    batch_pad = _round_up(batch, tm)
    if batch_pad != batch:
        x = jnp.pad(x, ((0, batch_pad - batch), (0, 0)))

    # --- bf16 activations/weights ---
    x = x.astype(jnp.bfloat16)
    w1 = w1.astype(jnp.bfloat16)
    w2 = w2.astype(jnp.bfloat16)

    grid = (batch_pad // tm,)
    out = pl.pallas_call(
        generator_kernel,
        out_shape=jax.ShapeDtypeStruct((batch_pad, img_dim), jnp.bfloat16),
        grid=grid,
        in_specs=[
            pl.BlockSpec((tm, k_pad), lambda i: (i, 0)),        # x tile
            pl.BlockSpec((k_pad, hidden), lambda i: (0, 0)),    # w1 (resident)
            pl.BlockSpec((1, hidden), lambda i: (0, 0)),        # b1 (resident)
            pl.BlockSpec((hidden, img_dim), lambda i: (0, 0)),  # w2 (resident)
            pl.BlockSpec((1, img_dim), lambda i: (0, 0)),       # b2 (resident)
        ],
        # Block last dim == full array dim (784), so no N padding and no crop.
        out_specs=pl.BlockSpec((tm, img_dim), lambda i: (i, 0)),
        compiler_params=pltpu.CompilerParams(
            dimension_semantics=("parallel",),
        ),
    )(x, w1, b1, w2, b2)

    # Only crop the batch tail when we actually padded it (usually a no-op).
    if batch_pad != batch:
        out = out[:batch]
    return out  # bf16; upcast downstream only if the consumer needs f32.


def reference_forward(x, w1, b1, w2, b2):
    h = x @ w1 + b1.reshape(1, -1)
    h = jnp.where(h > 0, h, 0.1 * h)
    y = h @ w2 + b2.reshape(1, -1)
    return jnp.tanh(y)


if __name__ == "__main__":
    # Small shapes consistent with the module: z_dim=64, hidden=256, img_dim=784
    batch, z_dim, hidden, img_dim = 8, 64, 256, 784

    key = jax.random.PRNGKey(0)
    kx, kw1, kb1, kw2, kb2 = jax.random.split(key, 5)

    x = jax.random.normal(kx, (batch, z_dim), dtype=jnp.float32)
    # Deterministic synthetic params (Linear weights/biases, small scale).
    # Biases are 1-D, matching PyTorch nn.Linear.
    w1 = jax.random.normal(kw1, (z_dim, hidden), dtype=jnp.float32) * 0.05
    b1 = jax.random.normal(kb1, (hidden,), dtype=jnp.float32) * 0.05
    w2 = jax.random.normal(kw2, (hidden, img_dim), dtype=jnp.float32) * 0.05
    b2 = jax.random.normal(kb2, (img_dim,), dtype=jnp.float32) * 0.05

    out = generator_forward(x, w1, b1, w2, b2)
    jax.block_until_ready(out)

    ref = reference_forward(x, w1, b1, w2, b2)
    assert out.shape == (batch, img_dim)
    assert out.dtype == jnp.bfloat16
    # Loose tolerance: bf16 operands + bf16 output store, f32 accumulation.
    assert jnp.allclose(out.astype(jnp.float32), ref, atol=2e-2, rtol=2e-2), \
        "mismatch vs reference"

    print("KERNEL_OK")
</pallas_src>

<mosaic_0001>
module attributes {stable_mosaic.version = 11 : i64} {
  func.func @generator_kernel(%arg0: i32, %arg1: memref<8x128xbf16, #tpu.memory_space<vmem>>, %arg2: memref<128x256xbf16, #tpu.memory_space<vmem>>, %arg3: memref<1x256xf32, #tpu.memory_space<vmem>>, %arg4: memref<256x784xbf16, #tpu.memory_space<vmem>>, %arg5: memref<1x784xf32, #tpu.memory_space<vmem>>, %arg6: memref<8x784xbf16, #tpu.memory_space<vmem>>) attributes {dimension_semantics = [#tpu.dimension_semantics<parallel>], iteration_bounds = array<i64: 1>, scalar_prefetch = 0 : i64, scratch_operands = 0 : i64, tpu.core_type = #tpu.core_type<tc>, window_params = [{transform_indices = @transform_0, window_bounds = array<i64: 8, 128>}, {pipeline_mode = #tpu.pipeline_mode<synchronous>, transform_indices = @transform_1, window_bounds = array<i64: 128, 256>}, {pipeline_mode = #tpu.pipeline_mode<synchronous>, transform_indices = @transform_2, window_bounds = array<i64: 1, 256>}, {pipeline_mode = #tpu.pipeline_mode<synchronous>, transform_indices = @transform_3, window_bounds = array<i64: 256, 784>}, {pipeline_mode = #tpu.pipeline_mode<synchronous>, transform_indices = @transform_4, window_bounds = array<i64: 1, 784>}, {transform_indices = @transform_5, window_bounds = array<i64: 8, 784>}]} {
    %c0 = arith.constant 0 : index
    %c0_0 = arith.constant 0 : index
    %0 = vector.load %arg1[%c0, %c0_0] : memref<8x128xbf16, #tpu.memory_space<vmem>>, vector<8x128xbf16>
    %c0_1 = arith.constant 0 : index
    %c0_2 = arith.constant 0 : index
    %1 = vector.load %arg2[%c0_1, %c0_2] : memref<128x256xbf16, #tpu.memory_space<vmem>>, vector<128x256xbf16>
    %cst = arith.constant dense<0.000000e+00> : vector<8x256xf32>
    %2 = tpu.matmul %0, %1, %cst {dimension_numbers = #tpu.dot_dimension_numbers<[1], [0], [0], [1], [0, 0, 1, 1], [], []>} : vector<8x128xbf16>, vector<128x256xbf16>, vector<8x256xf32> -> vector<8x256xf32>
    %c0_3 = arith.constant 0 : index
    %c0_4 = arith.constant 0 : index
    %3 = vector.load %arg3[%c0_3, %c0_4] : memref<1x256xf32, #tpu.memory_space<vmem>>, vector<1x256xf32>
    %4 = vector.broadcast %3 : vector<1x256xf32> to vector<8x256xf32>
    %5 = arith.addf %2, %4 : vector<8x256xf32>
    %cst_5 = arith.constant 0.000000e+00 : f32
    %6 = vector.broadcast %cst_5 : f32 to vector<8x256xf32>
    %7 = arith.cmpf ogt, %5, %6 : vector<8x256xf32>
    %cst_6 = arith.constant 1.000000e-01 : f32
    %8 = vector.broadcast %cst_6 : f32 to vector<8x256xf32>
    %9 = arith.mulf %8, %5 : vector<8x256xf32>
    %10 = arith.select %7, %5, %9 : vector<8x256xi1>, vector<8x256xf32>
    %11 = arith.truncf %10 : vector<8x256xf32> to vector<8x256xbf16>
    %c0_7 = arith.constant 0 : index
    %c0_8 = arith.constant 0 : index
    %12 = vector.load %arg4[%c0_7, %c0_8] : memref<256x784xbf16, #tpu.memory_space<vmem>>, vector<256x784xbf16>
    %cst_9 = arith.constant dense<0.000000e+00> : vector<8x784xf32>
    %13 = tpu.matmul %11, %12, %cst_9 {dimension_numbers = #tpu.dot_dimension_numbers<[1], [0], [0], [1], [0, 0, 1, 1], [], []>} : vector<8x256xbf16>, vector<256x784xbf16>, vector<8x784xf32> -> vector<8x784xf32>
    %c0_10 = arith.constant 0 : index
    %c0_11 = arith.constant 0 : index
    %14 = vector.load %arg5[%c0_10, %c0_11] : memref<1x784xf32, #tpu.memory_space<vmem>>, vector<1x784xf32>
    %15 = vector.broadcast %14 : vector<1x784xf32> to vector<8x784xf32>
    %16 = arith.addf %13, %15 : vector<8x784xf32>
    %17 = math.tanh %16 : vector<8x784xf32>
    %18 = arith.truncf %17 : vector<8x784xf32> to vector<8x784xbf16>
    %c0_12 = arith.constant 0 : index
    %c0_13 = arith.constant 0 : index
    %19 = vector.load %arg6[%c0_12, %c0_13] : memref<8x784xbf16, #tpu.memory_space<vmem>>, vector<8x784xbf16>
    tpu.vector_store %arg6[%c0_12, %c0_13], %18 {strides = array<i32>} : memref<8x784xbf16, #tpu.memory_space<vmem>>, vector<8x784xbf16>,
    return
  }
  func.func @transform_0(%arg0: i32) -> (i32, i32) {
    %c0_i32 = arith.constant 0 : i32
    %c0_i32_0 = arith.constant 0 : i32
    return %arg0, %c0_i32 : i32, i32
  }
  func.func @transform_1(%arg0: i32) -> (i32, i32) {
    %c0_i32 = arith.constant 0 : i32
    %c0_i32_0 = arith.constant 0 : i32
    %c0_i32_1 = arith.constant 0 : i32
    return %c0_i32, %c0_i32_0 : i32, i32
  }
  func.func @transform_2(%arg0: i32) -> (i32, i32) {
    %c0_i32 = arith.constant 0 : i32
    %c0_i32_0 = arith.constant 0 : i32
    %c0_i32_1 = arith.constant 0 : i32
    return %c0_i32, %c0_i32_0 : i32, i32
  }
  func.func @transform_3(%arg0: i32) -> (i32, i32) {
    %c0_i32 = arith.constant 0 : i32
    %c0_i32_0 = arith.constant 0 : i32
    %c0_i32_1 = arith.constant 0 : i32
    return %c0_i32, %c0_i32_0 : i32, i32
  }
  func.func @transform_4(%arg0: i32) -> (i32, i32) {
    %c0_i32 = arith.constant 0 : i32
    %c0_i32_0 = arith.constant 0 : i32
    %c0_i32_1 = arith.constant 0 : i32
    return %c0_i32, %c0_i32_0 : i32, i32
  }
  func.func @transform_5(%arg0: i32) -> (i32, i32) {
    %c0_i32 = arith.constant 0 : i32
    %c0_i32_0 = arith.constant 0 : i32
    return %arg0, %c0_i32 : i32, i32
  }
}

</mosaic_0001>

<bundles_post_ra>
// kernel: tpu_custom_call.1
= control target key start
LH: loop header
LB: loop body
LE: loop exit
PB: predicated region body
PF: predicated region fallthrough
CT: control target
= control target key end

     0   :  { %v1521_v2 = vmov 0   ;;  %s1981_s0 = inlined_call_operand.vmem [shape: bf16[8,128], index: 0, kind: input, shape index: {}]   ;;  %s1982_s1 = inlined_call_operand.vmem [shape: bf16[128,256], index: 1, kind: input, shape index: {}]   ;;  %s1983_s2 = inlined_call_operand.vmem [shape: f32[1,256], index: 2, kind: input, shape index: {}]   ;;  %s1984_s3 = inlined_call_operand.vmem [shape: bf16[256,784], index: 3, kind: input, shape index: {}]   ;;  %s1985_s4 = inlined_call_operand.vmem [shape: f32[1,784], index: 4, kind: input, shape index: {}]   ;;  %s1986_s5 = inlined_call_operand.hbm [shape: bf16[8,784], index: 5, kind: output, shape index: {}]  }
   0x1   :  { %v1299_v0 = vld [vmem:[%s1982_s1 + $0x4] ss:$8 sps:$4 sm:$0xff]   ;;  %v1301_v1 = vld [vmem:[%s1982_s1] ss:$8 sps:$4 sm:$0xff]   ;;  %163 = vmatprep.mubr.bf16.mxu0 %v1521_v2  ;;  %v1302_v3 = vld [vmem:[%s1982_s1 + $0x14] ss:$8 sps:$4 sm:$0xff]  }
   0x2   :  { %131 = vmatprep.subr.bf16.mxu0 %v1299_v0  ;;  %v1304_v4 = vld [vmem:[%s1982_s1 + $0x10] ss:$8 sps:$4 sm:$0xff]   ;;  %v1305_v5 = vld [vmem:[%s1982_s1 + $0x24] ss:$8 sps:$4 sm:$0xff]   ;;  %v1307_v6 = vld [vmem:[%s1982_s1 + $0x20] ss:$8 sps:$4 sm:$0xff]  }
   0x3   :  { %132 = vmatpush1.bf16.msra.mxu0 %v1301_v1  ;;  %v1308_v7 = vld [vmem:[%s1982_s1 + $0x34] ss:$8 sps:$4 sm:$0xff]   ;;  %v1310_v8 = vld [vmem:[%s1982_s1 + $0x30] ss:$8 sps:$4 sm:$0xff]   ;;  %v1323_v9 = vld [vmem:[%s1984_s3 + $0x4] ss:$28 sps:$4 sm:$0xff]  }
   0x4   :  { %133 = vmatprep.subr.bf16.mxu0 %v1302_v3  ;;  %v1311_v10 = vld [vmem:[%s1982_s1 + $0x44] ss:$8 sps:$4 sm:$0xff]   ;;  %921 = vmatprep.subr.bf16.mxu1 %v1323_v9  ;;  %v1328_v11 = vld [vmem:[%s1984_s3] ss:$28 sps:$4 sm:$0xff]   ;;  %v1334_v15 = vld [vmem:[%s1984_s3 + $0x38] ss:$28 sps:$4 sm:$0xff]  }
   0x5   :  { %v1329_v12 = vld [vmem:[%s1984_s3 + $0x3c] ss:$28 sps:$4 sm:$0xff]   ;;  %v1313_v13 = vld [vmem:[%s1982_s1 + $0x40] ss:$8 sps:$4 sm:$0xff]   ;;  %922 = vmatpush1.bf16.msra.mxu1 %v1328_v11  ;;  %v1335_v16 = vld [vmem:[%s1984_s3 + $0x74] ss:$28 sps:$4 sm:$0xff]  }
   0x6   :  { %v1314_v14 = vld [vmem:[%s1982_s1 + $0x54] ss:$8 sps:$4 sm:$0xff]   ;;  %923 = vmatprep.subr.bf16.mxu1 %v1329_v12  ;;  %v1316_v17 = vld [vmem:[%s1982_s1 + $0x50] ss:$8 sps:$4 sm:$0xff]   ;;  %v1317_v18 = vld [vmem:[%s1982_s1 + $0x64] ss:$8 sps:$4 sm:$0xff]  }
   0x7   :  { %134 = vmatpush1.bf16.msra.mxu0 %v1304_v4  ;;  %v1340_v19 = vld [vmem:[%s1984_s3 + $0x70] ss:$28 sps:$4 sm:$0xff]   ;;  %v1319_v21 = vld [vmem:[%s1982_s1 + $0x60] ss:$8 sps:$4 sm:$0xff]   ;;  %v1320_v22 = vld [vmem:[%s1982_s1 + $0x74] ss:$8 sps:$4 sm:$0xff]  }
   0x8   :  { %135 = vmatprep.subr.bf16.mxu0 %v1305_v5  ;;  %v1341_v20 = vld [vmem:[%s1984_s3 + $0xac] ss:$28 sps:$4 sm:$0xff]   ;;  %v1347_v24 = vld [vmem:[%s1984_s3 + $0xe4] ss:$28 sps:$4 sm:$0xff]   ;;  %v1322_v25 = vld [vmem:[%s1982_s1 + $0x70] ss:$8 sps:$4 sm:$0xff]  }
   0x9   :  { %924 = vmatpush1.bf16.msra.mxu1 %v1334_v15  ;;  %v1346_v23 = vld [vmem:[%s1984_s3 + $0xa8] ss:$28 sps:$4 sm:$0xff]   ;;  %v1352_v27 = vld [vmem:[%s1984_s3 + $0xe0] ss:$28 sps:$4 sm:$0xff]   ;;  %v1358_v32 = vld [vmem:[%s1984_s3 + $0x118] ss:$28 sps:$4 sm:$0xff]  }
   0xa   :  { %925 = vmatprep.subr.bf16.mxu1 %v1335_v16  ;;  %v1327_v26 = vld [vmem:[%s1984_s3 + $0xc] ss:$28 sps:$4 sm:$0xff]   ;;  %v1353_v28 = vld [vmem:[%s1984_s3 + $0x11c] ss:$28 sps:$4 sm:$0xff]   ;;  %v22_v29 = vld [vmem:[%s1981_s0] sm:$0xf] }
   0xb   :  { %136 = vmatpush1.bf16.msra.mxu0 %v1307_v6  ;;  %v1325_v30 = vld [vmem:[%s1984_s3 + $0x8] ss:$28 sps:$4 sm:$0xff]   ;;  %v1359_v33 = vld [vmem:[%s1984_s3 + $0x154] ss:$28 sps:$4 sm:$0xff]   ;;  %v1331_v34 = vld [vmem:[%s1984_s3 + $0x40] ss:$28 sps:$4 sm:$0xff]  }
   0xc   :  { %137 = vmatprep.subr.bf16.mxu0 %v1308_v7  ;;  %v1333_v31 = vld [vmem:[%s1984_s3 + $0x44] ss:$28 sps:$4 sm:$0xff]   ;;  %v1339_v35 = vld [vmem:[%s1984_s3 + $0x7c] ss:$28 sps:$4 sm:$0xff]   ;;  %v1364_v36 = vld [vmem:[%s1984_s3 + $0x150] ss:$28 sps:$4 sm:$0xff]  }
   0xd   :  { %926 = vmatpush1.bf16.msra.mxu1 %v1340_v19  ;;  %v1365_v37 = vld [vmem:[%s1984_s3 + $0x18c] ss:$28 sps:$4 sm:$0xff]   ;;  %v1337_v38 = vld [vmem:[%s1984_s3 + $0x78] ss:$28 sps:$4 sm:$0xff]   ;;  %v1371_v41 = vld [vmem:[%s1984_s3 + $0x1c4] ss:$28 sps:$4 sm:$0xff]  }
   0xe   :  { %927 = vmatprep.subr.bf16.mxu1 %v1341_v20  ;;  %v1345_v39 = vld [vmem:[%s1984_s3 + $0xb4] ss:$28 sps:$4 sm:$0xff]   ;;  %v1370_v40 = vld [vmem:[%s1984_s3 + $0x188] ss:$28 sps:$4 sm:$0xff]   ;;  %v1376_v44 = vld [vmem:[%s1984_s3 + $0x1c0] ss:$28 sps:$4 sm:$0xff]  }
   0xf   :  { %138 = vmatpush1.bf16.msra.mxu0 %v1310_v8  ;;  %v1343_v42 = vld [vmem:[%s1984_s3 + $0xb0] ss:$28 sps:$4 sm:$0xff]   ;;  %v1377_v45 = vld [vmem:[%s1984_s3 + $0x1fc] ss:$28 sps:$4 sm:$0xff]   ;;  %v1349_v46 = vld [vmem:[%s1984_s3 + $0xe8] ss:$28 sps:$4 sm:$0xff]  }
  0x10   :  { %139 = vmatprep.subr.bf16.mxu0 %v1311_v10  ;;  %v1351_v43 = vld [vmem:[%s1984_s3 + $0xec] ss:$28 sps:$4 sm:$0xff]   ;;  %v1382_v47 = vld [vmem:[%s1984_s3 + $0x1f8] ss:$28 sps:$4 sm:$0xff]   ;;  %v1357_v48 = vld [vmem:[%s1984_s3 + $0x124] ss:$28 sps:$4 sm:$0xff]  }
  0x11   :  { %928 = vmatpush1.bf16.msra.mxu1 %v1346_v23  ;;  %v1383_v49 = vld [vmem:[%s1984_s3 + $0x234] ss:$28 sps:$4 sm:$0xff]   ;;  %v1355_v50 = vld [vmem:[%s1984_s3 + $0x120] ss:$28 sps:$4 sm:$0xff]   ;;  %v1389_v53 = vld [vmem:[%s1984_s3 + $0x26c] ss:$28 sps:$4 sm:$0xff]  }
  0x12   :  { %929 = vmatprep.subr.bf16.mxu1 %v1347_v24  ;;  %v1388_v51 = vld [vmem:[%s1984_s3 + $0x230] ss:$28 sps:$4 sm:$0xff]   ;;  %v1363_v52 = vld [vmem:[%s1984_s3 + $0x15c] ss:$28 sps:$4 sm:$0xff]   ;;  %v1394_v55 = vld [vmem:[%s1984_s3 + $0x268] ss:$28 sps:$4 sm:$0xff]  }
  0x13   :  { %140 = vmatpush1.bf16.msra.mxu0 %v1313_v13  ;;  %v1361_v54 = vld [vmem:[%s1984_s3 + $0x158] ss:$28 sps:$4 sm:$0xff]   ;;  %v1395_v57 = vld [vmem:[%s1984_s3 + $0x2a4] ss:$28 sps:$4 sm:$0xff]   ;;  %v1367_v58 = vld [vmem:[%s1984_s3 + $0x190] ss:$28 sps:$4 sm:$0xff]  }
  0x14   :  { %141 = vmatprep.subr.bf16.mxu0 %v1314_v14  ;;  %v1369_v56 = vld [vmem:[%s1984_s3 + $0x194] ss:$28 sps:$4 sm:$0xff]   ;;  %v1400_v59 = vld [vmem:[%s1984_s3 + $0x2a0] ss:$28 sps:$4 sm:$0xff]   ;;  %v1375_v60 = vld [vmem:[%s1984_s3 + $0x1cc] ss:$28 sps:$4 sm:$0xff]  }
  0x15   :  { %930 = vmatpush1.bf16.msra.mxu1 %v1352_v27  ;;  %v1401_v61 = vld [vmem:[%s1984_s3 + $0x2dc] ss:$28 sps:$4 sm:$0xff]   ;;  %v1373_v62 = vld [vmem:[%s1984_s3 + $0x1c8] ss:$28 sps:$4 sm:$0xff]   ;;  %v1393_v4 = vld [vmem:[%s1984_s3 + $0x274] ss:$28 sps:$4 sm:$0xff]  }
  0x16   :  { %931 = vmatprep.subr.bf16.mxu1 %v1353_v28  ;;  %v1406_v63 = vld [vmem:[%s1984_s3 + $0x2d8] ss:$28 sps:$4 sm:$0xff]   ;;  %v1381_v0 = vld [vmem:[%s1984_s3 + $0x204] ss:$28 sps:$4 sm:$0xff]  }
  0x17   :  { %142 = vmatpush1.bf16.msra.mxu0 %v1316_v17  ;;  %v1379_v1 = vld [vmem:[%s1984_s3 + $0x200] ss:$28 sps:$4 sm:$0xff]   ;;  %v1385_v3 = vld [vmem:[%s1984_s3 + $0x238] ss:$28 sps:$4 sm:$0xff]  }
  0x18   :  { %143 = vmatprep.subr.bf16.mxu0 %v1317_v18  ;;  %v1387_v2 = vld [vmem:[%s1984_s3 + $0x23c] ss:$28 sps:$4 sm:$0xff]  }
  0x19   :  { %932 = vmatpush1.bf16.msra.mxu1 %v1358_v32 }
  0x1a   :  { %933 = vmatprep.subr.bf16.mxu1 %v1359_v33 }
  0x1b   :  { %144 = vmatpush1.bf16.msra.mxu0 %v1319_v21 }
  0x1c   :  { %145 = vmatprep.subr.bf16.mxu0 %v1320_v22 }
  0x1d   :  { %934 = vmatpush1.bf16.msra.mxu1 %v1364_v36 }
  0x1e   :  { %935 = vmatprep.subr.bf16.mxu1 %v1365_v37 }
  0x1f   :  { %146 = vmatpush1.bf16.msra.mxu0 %v1322_v25 }
  0x20   :  { %962 = vmatprep.subr.bf16.mxu0 %v1327_v26 }
  0x21   :  { %936 = vmatpush1.bf16.msra.mxu1 %v1370_v40 }
  0x22   :  { %164 = vmatmul.mubr.bf16.vlgmr.msra.gmra.mrb[0].mxu0 %v22_v29  ;;  %937 = vmatprep.subr.bf16.mxu1 %v1371_v41 }
  0x23   :  { %963 = vmatpush1.bf16.msra.mxu0 %v1325_v30 }
  0x24   :  { %964 = vmatprep.subr.bf16.mxu0 %v1333_v31 }
  0x25   :  { %938 = vmatpush1.bf16.msra.mxu1 %v1376_v44 }
  0x26   :  { %939 = vmatprep.subr.bf16.mxu1 %v1377_v45 }
  0x27   :  { %965 = vmatpush1.bf16.msra.mxu0 %v1331_v34 }
  0x28   :  { %966 = vmatprep.subr.bf16.mxu0 %v1339_v35 }
  0x29   :  { %940 = vmatpush1.bf16.msra.mxu1 %v1382_v47 }
  0x2a   :  { %941 = vmatprep.subr.bf16.mxu1 %v1383_v49 }
  0x2b   :  { %967 = vmatpush1.bf16.msra.mxu0 %v1337_v38 }
  0x2c   :  { %968 = vmatprep.subr.bf16.mxu0 %v1345_v39 }
  0x2d   :  { %942 = vmatpush1.bf16.msra.mxu1 %v1388_v51 }
  0x2e   :  { %943 = vmatprep.subr.bf16.mxu1 %v1389_v53 }
  0x2f   :  { %969 = vmatpush1.bf16.msra.mxu0 %v1343_v42 }
  0x30   :  { %970 = vmatprep.subr.bf16.mxu0 %v1351_v43 }
  0x31   :  { %944 = vmatpush1.bf16.msra.mxu1 %v1394_v55 }
  0x32   :  { %945 = vmatprep.subr.bf16.mxu1 %v1395_v57 }
  0x33   :  { %971 = vmatpush1.bf16.msra.mxu0 %v1349_v46 }
  0x34   :  { %972 = vmatprep.subr.bf16.mxu0 %v1357_v48 }
  0x35   :  { %946 = vmatpush1.bf16.msra.mxu1 %v1400_v59 }
  0x36   :  { %947 = vmatprep.subr.bf16.mxu1 %v1401_v61 }
  0x37   :  { %973 = vmatpush1.bf16.msra.mxu0 %v1355_v50 }
  0x38   :  { %974 = vmatprep.subr.bf16.mxu0 %v1363_v52 }
  0x39   :  { %948 = vmatpush1.bf16.msra.mxu1 %v1406_v63 }
  0x3b   :  { %975 = vmatpush1.bf16.msra.mxu0 %v1361_v54 }
  0x3c   :  { %976 = vmatprep.subr.bf16.mxu0 %v1369_v56 }
  0x3f   :  { %977 = vmatpush1.bf16.msra.mxu0 %v1367_v58 }
  0x40   :  { %978 = vmatprep.subr.bf16.mxu0 %v1375_v60 }
  0x43   :  { %979 = vmatpush1.bf16.msra.mxu0 %v1373_v62 }
  0x44   :  { %980 = vmatprep.subr.bf16.mxu0 %v1381_v0 }
  0x47   :  { %981 = vmatpush1.bf16.msra.mxu0 %v1379_v1 }
  0x48   :  { %982 = vmatprep.subr.bf16.mxu0 %v1387_v2 }
  0x49   :  { %10 = vsyncpa [#allocation3], 0  ;;  %v1391_v5 = vld [vmem:[%s1984_s3 + $0x270] ss:$28 sps:$4 sm:$0xff]   ;;  %v1397_v7 = vld [vmem:[%s1984_s3 + $0x2a8] ss:$28 sps:$4 sm:$0xff]   ;;  %v41_v20 = vlaneseq }
  0x4a   :  { %v1399_v6 = vld [vmem:[%s1984_s3 + $0x2ac] ss:$28 sps:$4 sm:$0xff]   ;;  %v1405_v8 = vld [vmem:[%s1984_s3 + $0x2e4] ss:$28 sps:$4 sm:$0xff]   ;;  %v1407_v10 = vld [vmem:[%s1984_s3 + $0x314] ss:$28 sps:$4 sm:$0xff]  }
  0x4b   :  { %983 = vmatpush1.bf16.msra.mxu0 %v1385_v3  ;;  %v1403_v9 = vld [vmem:[%s1984_s3 + $0x2e0] ss:$28 sps:$4 sm:$0xff]   ;;  %v1409_v12 = vld [vmem:[%s1984_s3 + $0x318] ss:$28 sps:$4 sm:$0xff]   ;;  %v1412_v13 = vld [vmem:[%s1984_s3 + $0x310] ss:$28 sps:$4 sm:$0xff]   ;;  %949 = vmatprep.subr.bf16.mxu1 %v1407_v10 }
  0x4c   :  { %984 = vmatprep.subr.bf16.mxu0 %v1393_v4  ;;  %v1411_v11 = vld [vmem:[%s1984_s3 + $0x31c] ss:$28 sps:$4 sm:$0xff]   ;;  %950 = vmatpush1.bf16.msra.mxu1 %v1412_v13  ;;  %v1413_v14 = vld [vmem:[%s1984_s3 + $0x34c] ss:$28 sps:$4 sm:$0xff]   ;;  %v1417_v15 = vld [vmem:[%s1984_s3 + $0x354] ss:$28 sps:$4 sm:$0xff]  }
  0x4d   :  { %v1415_v16 = vld [vmem:[%s1984_s3 + $0x350] ss:$28 sps:$4 sm:$0xff]   ;;  %v1418_v17 = vld [vmem:[%s1984_s3 + $0x348] ss:$28 sps:$4 sm:$0xff]   ;;  %951 = vmatprep.subr.bf16.mxu1 %v1413_v14  ;;  %v1422_v19 = vld [vmem:[%s1984_s3 + $0x1d8] ss:$28 sps:$4 sm:$0xff]  }
  0x4e   :  { %v1421_v18 = vld [vmem:[%s1984_s3 + $0x14] ss:$28 sps:$4 sm:$0xff]   ;;  %v1802_v21 = vshrl.u32 %v41_v20, 7  ;;  %v39_v23 = vld [vmem:[%s1983_s2] sm:$0x3]  ;;  %vm1123_vm2 = vcmask 125952  }
  0x4f   :  { %985 = vmatpush1.bf16.msra.mxu0 %v1391_v5  ;;  %v1419_v38 = vld [vmem:[%s1984_s3 + $0x10] ss:$28 sps:$4 sm:$0xff]   ;;  %v1423_v39 = vld [vmem:[%s1984_s3 + $0x18] ss:$28 sps:$4 sm:$0xff]   ;;  %v1424_v43 = vld [vmem:[%s1984_s3 + $0x48] ss:$28 sps:$4 sm:$0xff]  }
  0x50   :  { %986 = vmatprep.subr.bf16.mxu0 %v1399_v6  ;;  %952 = vmatpush1.bf16.msra.mxu1 %v1418_v17  ;;  %v43_v22 = vsub.s32 0, %v1802_v21  ;;  %v47_v24 = vsub.s32 1, %v1802_v21  ;;  %v1426_v41 = vld [vmem:[%s1984_s3 + $0x4c] ss:$28 sps:$4 sm:$0xff]   ;;  %v1431_v45 = vld [vmem:[%s1984_s3 + $0x84] ss:$28 sps:$4 sm:$0xff]  }
  0x51   :  { %1003 = vmatprep.subr.bf16.mxu1 %v1421_v18  ;;  %v1427_v42 = vld [vmem:[%s1984_s3 + $0x210] ss:$28 sps:$4 sm:$0xff]   ;;  %v1432_v46 = vld [vmem:[%s1984_s3 + $0x248] ss:$28 sps:$4 sm:$0xff]   ;;  %v1429_v47 = vld [vmem:[%s1984_s3 + $0x80] ss:$28 sps:$4 sm:$0xff]  }
  0x52   :  { %v44_v25 = vrot.slane %v39_v23, %v43_v22  ;;  %v48_v26 = vrot.slane %v39_v23, %v47_v24  ;;  %v1428_v44 = vld [vmem:[%s1984_s3 + $0x50] ss:$28 sps:$4 sm:$0xff]   ;;  %v1433_v48 = vld [vmem:[%s1984_s3 + $0x88] ss:$28 sps:$4 sm:$0xff]   ;;  %v1436_v49 = vld [vmem:[%s1984_s3 + $0xbc] ss:$28 sps:$4 sm:$0xff]  }
  0x53   :  { %987 = vmatpush1.bf16.msra.mxu0 %v1397_v7  ;;  %v1437_v50 = vld [vmem:[%s1984_s3 + $0x280] ss:$28 sps:$4 sm:$0xff]   ;;  %v1434_v51 = vld [vmem:[%s1984_s3 + $0xb8] ss:$28 sps:$4 sm:$0xff]   ;;  %v1439_v55 = vld [vmem:[%s1984_s3 + $0xf0] ss:$28 sps:$4 sm:$0xff]  }
  0x54   :  { %988 = vmatprep.subr.bf16.mxu0 %v1405_v8  ;;  %v1438_v52 = vld [vmem:[%s1984_s3 + $0xc0] ss:$28 sps:$4 sm:$0xff]   ;;  %v1441_v53 = vld [vmem:[%s1984_s3 + $0xf4] ss:$28 sps:$4 sm:$0xff]   ;;  %v1446_v57 = vld [vmem:[%s1984_s3 + $0x12c] ss:$28 sps:$4 sm:$0xff]  }
  0x55   :  { %v1442_v54 = vld [vmem:[%s1984_s3 + $0x2b8] ss:$28 sps:$4 sm:$0xff]   ;;  %v1447_v58 = vld [vmem:[%s1984_s3 + $0x2f0] ss:$28 sps:$4 sm:$0xff]   ;;  %v1444_v59 = vld [vmem:[%s1984_s3 + $0x128] ss:$28 sps:$4 sm:$0xff]  }
  0x56   :  { %v1443_v56 = vld [vmem:[%s1984_s3 + $0xf8] ss:$28 sps:$4 sm:$0xff]   ;;  %v1448_v60 = vld [vmem:[%s1984_s3 + $0x130] ss:$28 sps:$4 sm:$0xff]   ;;  %v1451_v61 = vld [vmem:[%s1984_s3 + $0x164] ss:$28 sps:$4 sm:$0xff]  }
  0x57   :  { %989 = vmatpush1.bf16.msra.mxu0 %v1403_v9  ;;  %v1452_v62 = vld [vmem:[%s1984_s3 + $0x328] ss:$28 sps:$4 sm:$0xff]   ;;  %v1449_v63 = vld [vmem:[%s1984_s3 + $0x160] ss:$28 sps:$4 sm:$0xff]   ;;  %v1454_v3 = vld [vmem:[%s1984_s3 + $0x198] ss:$28 sps:$4 sm:$0xff]  }
  0x58   :  { %990 = vmatprep.subr.bf16.mxu0 %v1411_v11  ;;  %v1453_v0 = vld [vmem:[%s1984_s3 + $0x168] ss:$28 sps:$4 sm:$0xff]   ;;  %v1456_v1 = vld [vmem:[%s1984_s3 + $0x19c] ss:$28 sps:$4 sm:$0xff]   ;;  %v1461_v5 = vld [vmem:[%s1984_s3 + $0x1d4] ss:$28 sps:$4 sm:$0xff]  }
  0x59   :  { %v1457_v2 = vld [vmem:[%s1984_s3 + $0x360] ss:$28 sps:$4 sm:$0xff]   ;;  %v1459_v6 = vld [vmem:[%s1984_s3 + $0x1d0] ss:$28 sps:$4 sm:$0xff]   ;;  %v1462_v8 = vld [vmem:[%s1984_s3 + $0x208] ss:$28 sps:$4 sm:$0xff]  }
  0x5a   :  { %v1458_v4 = vld [vmem:[%s1984_s3 + $0x1a0] ss:$28 sps:$4 sm:$0xff]   ;;  %v1464_v7 = vld [vmem:[%s1984_s3 + $0x20c] ss:$28 sps:$4 sm:$0xff]   ;;  %v1473_v13 = vld [vmem:[%s1984_s3 + $0x2b4] ss:$28 sps:$4 sm:$0xff]  }
  0x5b   :  { %991 = vmatpush1.bf16.msra.mxu0 %v1409_v12  ;;  %v1467_v9 = vld [vmem:[%s1984_s3 + $0x244] ss:$28 sps:$4 sm:$0xff]   ;;  %v1470_v11 = vld [vmem:[%s1984_s3 + $0x27c] ss:$28 sps:$4 sm:$0xff]   ;;  %v1471_v14 = vld [vmem:[%s1984_s3 + $0x2b0] ss:$28 sps:$4 sm:$0xff]  }
  0x5c   :  { %992 = vmatprep.subr.bf16.mxu0 %v1417_v15  ;;  %v1465_v10 = vld [vmem:[%s1984_s3 + $0x240] ss:$28 sps:$4 sm:$0xff]   ;;  %v1468_v12 = vld [vmem:[%s1984_s3 + $0x278] ss:$28 sps:$4 sm:$0xff]   ;;  %v1476_v15 = vld [vmem:[%s1984_s3 + $0x2ec] ss:$28 sps:$4 sm:$0xff]  }
  0x5d   :  { %v1479_v17 = vld [vmem:[%s1984_s3 + $0x324] ss:$28 sps:$4 sm:$0xff]   ;;  %v1480_v20 = vld [vmem:[%s1984_s3 + $0x358] ss:$28 sps:$4 sm:$0xff]   ;;  %v320_v23 = vsub.s32 2, %v1802_v21 }
  0x5e   :  { %v1477_v18 = vld [vmem:[%s1984_s3 + $0x320] ss:$28 sps:$4 sm:$0xff]  }
  0x5f   :  { %993 = vmatpush1.bf16.msra.mxu0 %v1415_v16  ;;  %v1474_v16 = vld [vmem:[%s1984_s3 + $0x2e8] ss:$28 sps:$4 sm:$0xff]  }
  0x60   :  { %1275 = vmatprep.subr.bf16.mxu0 %v1422_v19  ;;  %v1482_v19 = vld [vmem:[%s1984_s3 + $0x35c] ss:$28 sps:$4 sm:$0xff]   ;;  %s1522_s3 = smov [#allocation2]  }
  0xf5   :  { %v165_v27 = vpop.f32.mrb[0].mxu0 }
  0xf6   :  { %v166_v28 = vadd.f32 %v165_v27, %v44_v25  ;;  %v167_v29 = vpop.f32.mrb[1].mxu0  ;;  %v308_v25 = vld [vmem:[%s1985_s4] sm:$0x7f]  ;;  %s1131_s4 = sshll.u32 %s1522_s3, 4  ;;  %s1132_s4 = int_to_ptr.vmem [resolvable:$true] %s1131_s4 }
  0xf7   :  { %v168_v30 = vadd.f32 %v167_v29, %v48_v26  ;;  %v169_v31 = vpop.f32.mrb[2].mxu0  ;;  %v324_v26 = vsub.s32 3, %v1802_v21  ;;  %v313_v27 = vrot.slane %v308_v25, %v43_v22  ;;  %v317_v29 = vrot.slane %v308_v25, %v47_v24  ;;  %s1497_s10 = scalar_lea.vmem %s1132_s4, 448  ;;  %p1502_p1 = scmp.lt.s32.totalorder %s1132_s4, %s1132_s4 }
  0xf8   :  { %vm172_vm0 = vcmp.gt.f32.partialorder %v166_v28, 0.0  ;;  %v174_v32 = vmul.f32 0.1, %v166_v28  ;;  %v170_v33 = vpop.f32.mrb[3].mxu0  ;;  %p1498_p0 = scmp.ne.s32.totalorder %s1132_s4, %s1497_s10  ;;  %p1503_p2 = scmp.lt.s32.totalorder %s1497_s10, %s1497_s10 }
  0xf9   :  { %vm173_vm1 = vcmp.gt.f32.partialorder %v168_v30, 0.0  ;;  %v175_v34 = vmul.f32 0.1, %v168_v30 }
  0xfa   :  { %v176_v35 = vsel %vm172_vm0, %v166_v28, %v174_v32  ;;  %v321_v28 = vrot.slane %v308_v25, %v320_v23  ;;  %p1504_p3 = por %p1503_p2, %p1502_p1 }
  0xfb   :  { %v177_v36 = vsel %vm173_vm1, %v168_v30, %v175_v34  ;;  %v1819_v40 = vpack.c.bf16 %v176_v35, %v176_v35  ;;  %v325_v30 = vrot.slane %v308_v25, %v324_v26 }
  0xfc   :  { %v179_v37 = vpack.c.bf16 %v177_v36, %v177_v36  ;;  %p1505_p4 = pnand %p1504_p3, %p1498_p0 }
  0xfe   :  { %953 = vmatprep.mubr.bf16.mxu1 %v179_v37  ;;  %994 = vmatprep.mubr.bf16.mxu0 %v179_v37 }
  0xff   :  { %954 = vmatmul.mubr.bf16.vlgmr.msra.gmra.mrb[0].mxu1 %v1819_v40  ;;  %995 = vmatmul.mubr.bf16.vlgmr.msra.gmra.mrb[4].mxu0 %v1819_v40 }
 0x100   :  { %1004 = vmatpush1.bf16.msra.mxu1 %v1419_v38  ;;  %1276 = vmatpush3.bf16.msra.mxu0 %v1423_v39 }
 0x101   :  { %1035 = vmatprep.mubr.bf16.mxu1 %v179_v37  ;;  %1076 = vmatprep.mubr.bf16.mxu0 %v179_v37 }
 0x102   :  { %1005 = vmatprep.subr.bf16.mxu1 %v1426_v41  ;;  %1277 = vmatprep.subr.bf16.mxu0 %v1427_v42 }
 0x104   :  { %1006 = vmatpush1.bf16.msra.mxu1 %v1424_v43  ;;  %1278 = vmatpush3.bf16.msra.mxu0 %v1428_v44 }
 0x105   :  { %1007 = vmatprep.subr.bf16.mxu1 %v1431_v45  ;;  %1279 = vmatprep.subr.bf16.mxu0 %v1432_v46 }
 0x108   :  { %1008 = vmatpush1.bf16.msra.mxu1 %v1429_v47  ;;  %1280 = vmatpush3.bf16.msra.mxu0 %v1433_v48  ;;  %v336_v47 = vsub.s32 6, %v1802_v21 }
 0x109   :  { %1009 = vmatprep.subr.bf16.mxu1 %v1436_v49  ;;  %1281 = vmatprep.subr.bf16.mxu0 %v1437_v50 }
 0x10a   :  { %v337_v49 = vrot.slane %v308_v25, %v336_v47 }
 0x10c   :  { %1010 = vmatpush1.bf16.msra.mxu1 %v1434_v51  ;;  %1282 = vmatpush3.bf16.msra.mxu0 %v1438_v52 }
 0x10d   :  { %1011 = vmatprep.subr.bf16.mxu1 %v1441_v53  ;;  %1283 = vmatprep.subr.bf16.mxu0 %v1442_v54 }
 0x110   :  { %1012 = vmatpush1.bf16.msra.mxu1 %v1439_v55  ;;  %1284 = vmatpush3.bf16.msra.mxu0 %v1443_v56 }
 0x111   :  { %1013 = vmatprep.subr.bf16.mxu1 %v1446_v57  ;;  %1285 = vmatprep.subr.bf16.mxu0 %v1447_v58  ;;  %v328_v57 = vsub.s32 4, %v1802_v21  ;;  %v332_v58 = vsub.s32 5, %v1802_v21 }
 0x114   :  { %1014 = vmatpush1.bf16.msra.mxu1 %v1444_v59  ;;  %1286 = vmatpush3.bf16.msra.mxu0 %v1448_v60  ;;  %v329_v59 = vrot.slane %v308_v25, %v328_v57  ;;  %v333_v60 = vrot.slane %v308_v25, %v332_v58 }
 0x115   :  { %1015 = vmatprep.subr.bf16.mxu1 %v1451_v61  ;;  %1287 = vmatprep.subr.bf16.mxu0 %v1452_v62 }
 0x118   :  { %1016 = vmatpush1.bf16.msra.mxu1 %v1449_v63  ;;  %1288 = vmatpush3.bf16.msra.mxu0 %v1453_v0 }
 0x119   :  { %1017 = vmatprep.subr.bf16.mxu1 %v1456_v1  ;;  %1289 = vmatprep.subr.bf16.mxu0 %v1457_v2 }
 0x11c   :  { %1018 = vmatpush1.bf16.msra.mxu1 %v1454_v3  ;;  %1290 = vmatpush3.bf16.msra.mxu0 %v1458_v4 }
 0x11d   :  { %1019 = vmatprep.subr.bf16.mxu1 %v1461_v5 }
 0x11f   :  { %1077 = vmatmul.mubr.bf16.vlgmr.msra.gmra.mrb[8].mxu0 %v1819_v40 }
 0x120   :  { %1020 = vmatpush1.bf16.msra.mxu1 %v1459_v6 }
 0x121   :  { %1021 = vmatprep.subr.bf16.mxu1 %v1464_v7 }
 0x124   :  { %1022 = vmatpush1.bf16.msra.mxu1 %v1462_v8 }
 0x125   :  { %1023 = vmatprep.subr.bf16.mxu1 %v1467_v9 }
 0x128   :  { %1024 = vmatpush1.bf16.msra.mxu1 %v1465_v10 }
 0x129   :  { %1025 = vmatprep.subr.bf16.mxu1 %v1470_v11 }
 0x12c   :  { %1026 = vmatpush1.bf16.msra.mxu1 %v1468_v12 }
 0x12d   :  { %1027 = vmatprep.subr.bf16.mxu1 %v1473_v13 }
 0x130   :  { %1028 = vmatpush1.bf16.msra.mxu1 %v1471_v14 }
 0x131   :  { %1029 = vmatprep.subr.bf16.mxu1 %v1476_v15 }
 0x134   :  { %1030 = vmatpush1.bf16.msra.mxu1 %v1474_v16 }
 0x135   :  { %1031 = vmatprep.subr.bf16.mxu1 %v1479_v17 }
 0x138   :  { %1032 = vmatpush1.bf16.msra.mxu1 %v1477_v18 }
 0x139   :  { %1033 = vmatprep.subr.bf16.mxu1 %v1482_v19 }
 0x13c   :  { %1034 = vmatpush1.bf16.msra.mxu1 %v1480_v20 }
 0x13f   :  { %1036 = vmatmul.mubr.bf16.vlgmr.msra.gmra.mrb[4].mxu1 %v1819_v40 }
 0x1d2   :  { %v955_v31 = vpop.f32.mrb[0].mxu1  ;;  %v996_v32 = vpop.f32.mrb[4].mxu0 }
 0x1d3   :  { %v956_v33 = vadd.f32 %v955_v31, %v313_v27  ;;  %v997_v34 = vadd.f32 %v996_v32, %v321_v28  ;;  %v957_v35 = vpop.f32.mrb[1].mxu1  ;;  %v998_v36 = vpop.f32.mrb[5].mxu0 }
 0x1d4   :  { %v958_v37 = vadd.f32 %v957_v35, %v317_v29  ;;  %v999_v38 = vadd.f32 %v998_v36, %v325_v30  ;;  %v959_v39 = vpop.f32.mrb[2].mxu1  ;;  %v1000_v40 = vpop.f32.mrb[6].mxu0 }
 0x1d5   :  { %1483 = vtanh.f32 %v956_v33  ;;  %v960_v41 = vpop.f32.mrb[3].mxu1  ;;  %v1001_v42 = vpop.f32.mrb[7].mxu0 }
 0x1d6   :  { %1485 = vtanh.f32 %v997_v34 }
 0x1d7   :  { %1487 = vtanh.f32 %v958_v37 }
 0x1d8   :  { %1489 = vtanh.f32 %v999_v38 }
 0x1df   :  { %v1484_v22 = vpop.eup %1483 }
 0x1e0   :  { %v1486_v43 = vpop.eup %1485 }
 0x1e1   :  { %v1488_v24 = vpop.eup %1487 }
 0x1e2   :  { %v1490_v44 = vpop.eup %1489  ;;  %v1271_v45 = vpack.c.bf16 %v1488_v24, %v1484_v22 }
 0x1e3   :  { %v1272_v46 = vpack.c.bf16 %v1490_v44, %v1486_v43 }
 0x1e4   :  { %1120 = vst [vmem:[#allocation2] sm:$0xff] %v1271_v45 }
 0x1e5   :  { %1121 = vst [vmem:[#allocation2 + $0x8] sm:$0xff] %v1272_v46 }
 0x1f2   :  { %v1291_v48 = vpop.f32.mrb[8].mxu0 }
 0x1f3   :  { %v1292_v50 = vpop.f32.mrb[9].mxu0 }
 0x1f4   :  { %v1293_v51 = vadd.f32 %v1292_v50, %v1291_v48  ;;  %v1294_v52 = vpop.f32.mrb[10].mxu0 }
 0x1f5   :  { %v1295_v53 = vpop.f32.mrb[11].mxu0 }
 0x1f6   :  { %v1079_v54 = vadd.f32 %v1293_v51, %v337_v49 }
 0x1f8   :  { %1491 = vtanh.f32 %v1079_v54 }
 0x202   :  { %v1492_v55 = vpop.eup %1491 }
 0x203   :  { %v1274_v56 = vpack.c.bf16 %v1492_v55, %v1492_v55 }
 0x205   :  { %1124 = vst.msk [vmem:[#allocation2 + $0x18] sm:$0xf] %vm1123_vm2, %v1274_v56 }
 0x212   :  { %v1037_v61 = vpop.f32.mrb[4].mxu1 }
 0x213   :  { %v1038_v62 = vadd.f32 %v1037_v61, %v329_v59  ;;  %v1039_v63 = vpop.f32.mrb[5].mxu1 }
 0x214   :  { %v1040_v0 = vadd.f32 %v1039_v63, %v333_v60  ;;  %v1041_v1 = vpop.f32.mrb[6].mxu1 }
 0x215   :  { %1493 = vtanh.f32 %v1038_v62  ;;  %v1042_v2 = vpop.f32.mrb[7].mxu1 }
 0x216   :  { %1495 = vtanh.f32 %v1040_v0 }
 0x21f   :  { %v1494_v3 = vpop.eup %1493 }
 0x220   :  { %v1496_v4 = vpop.eup %1495 }
 0x221   :  { %v1273_v5 = vpack.c.bf16 %v1496_v4, %v1494_v3 }
 0x223   :  { %1122 = vst [vmem:[#allocation2 + $0x10] sm:$0xff] %v1273_v5 }
 0x224   :  { %1508 = shalt.err (!%p1505_p4)
}
 0x225   :  { %s1509_s13 = scalar_lea.hbm %s1986_s5, 448 }
 0x226   :  { %p1510_p5 = scmp.ne.s32.totalorder %s1986_s5, %s1509_s13  ;;  %p1513_p6 = scmp.lt.u32.totalorder %s1509_s13, %s1986_s5 }
 0x228   :  { %p1515_p7 = pnand %p1513_p6, %p1510_p5 }
 0x22a   :  { %1518 = shalt.err (!%p1515_p7)
}
 0x22b   :  { %1134 = dma.vmem_to_hbm [thread:$0]  %s1132_s4, 448, %s1986_s5, [#allocation3]  }
 0x22c   :  { %1519 = dma.done.wait [#allocation3], 448  }
 0x22d   :  { %1520 = vsyncadd [#allocation3], 4294966848 }
 0x22e   :  { %1138 = vsyncpa [#allocation3], 1 }

</bundles_post_ra>
